<compile_context>
chip_gen: v5e
topology: v5e:2x2
jax: 0.10.0
libtpu: 0.0.40
codegen_flags: <defaults>
</compile_context>

<pallas_src>
import functools

import jax
import jax.numpy as jnp
from jax.experimental import pallas as pl
from jax.experimental.pallas import tpu as pltpu


def _pool_kernel(x_ref, w1_ref, b1_ref, w2_ref, b2_ref, y_ref, *,
                 n_nodes, d, vpu_out):
    # x_ref:  (TG, N*D) lane-dense packed node features
    # w1_ref: (D, D), b1_ref: (1, D)
    # w2_ref: (1, D) if vpu_out else (D, O); b2_ref: (1, O)
    # y_ref:  (TG, O)
    x = x_ref[...].astype(jnp.float32)

    # sum readout over nodes (dgl copy_src + sum reducer):
    # unrolled static lane slices -> cheap VPU adds, no XLU sublane reduce.
    pooled = x[:, 0:d]
    for n in range(1, n_nodes):
        pooled = pooled + x[:, n * d:(n + 1) * d]

    # Linear(D, D) + Tanh (MXU matmul, f32 accumulate; tanh on the small
    # pooled (TG, D) tile -> EUP slot, never the binding unit here).
    h = jnp.dot(pooled, w1_ref[...], preferred_element_type=jnp.float32)
    h = jnp.tanh(h + b1_ref[...])

    # Linear(D, O)
    if vpu_out:
        # O == 1: VPU broadcast-multiply + row reduce instead of wasting the
        # MXU on a 1-column matmul.
        y = jnp.sum(h * w2_ref[...], axis=-1, keepdims=True) + b2_ref[...]
    else:
        y = jnp.dot(h, w2_ref[...], preferred_element_type=jnp.float32)
        y = y + b2_ref[...]

    y_ref[...] = y.astype(y_ref.dtype)


def pool_forward(x, w1, b1, w2, b2):
    """x: (G, N, D) dense-batched node features (padded node rows must be 0).

    w1: (D, D), b1: (1, D)  -- first Linear, pre-transposed for  pooled @ W.
    w2: (D, O), b2: (1, O)  -- second Linear, pre-transposed for  h @ W.
    Returns y_hat: (G, O) in float32.
    """
    G, N, D = x.shape
    O = w2.shape[1]

    # lane-dense packing: contiguous rows, last dim a multiple of 128 for
    # typical N*D; avoids 4x lane padding of a (.., D=32) trailing dim.
    x2 = x.reshape(G, N * D)

    use_vpu_out = (O == 1)
    w2_in = jnp.transpose(w2) if use_vpu_out else w2  # (1, D) or (D, O)

    # ---- graph-tile sizing -------------------------------------------------
    # Target ~4 MiB per x buffer (8 MiB double-buffered): fits the scoped-VMEM
    # default on v5e/v6e/v7x, amortizes the ~0.35us per-step overhead, and
    # gives a large MXU M dimension. Do NOT tune this up to v6e's 128 MiB --
    # v7x only has 64 MiB VMEM per TensorCore.
    bytes_per_graph = N * D * x.dtype.itemsize
    tg = (4 << 20) // max(bytes_per_graph, 1)
    tg = max(8, min(tg, 4096))
    if tg >= G:
        tg = G           # block equals full graph dim -> no padding needed
        g_pad = G
    else:
        tg = max(8, (tg // 8) * 8)          # sublane-aligned tile
        g_pad = pl.cdiv(G, tg) * tg

    if g_pad != G:
        x2 = jnp.pad(x2, ((0, g_pad - G), (0, 0)))

    grid = (g_pad // tg,)

    kernel = functools.partial(_pool_kernel, n_nodes=N, d=D,
                               vpu_out=use_vpu_out)

    y = pl.pallas_call(
        kernel,
        out_shape=jax.ShapeDtypeStruct((g_pad, O), jnp.float32),
        grid=grid,
        in_specs=[
            pl.BlockSpec((tg, N * D), lambda i: (i, 0)),   # pipelined x tiles
            pl.BlockSpec((D, D), lambda i: (0, 0)),        # weights stay
            pl.BlockSpec((1, D), lambda i: (0, 0)),        # resident in VMEM
            pl.BlockSpec(w2_in.shape, lambda i: (0, 0)),
            pl.BlockSpec((1, O), lambda i: (0, 0)),
        ],
        out_specs=pl.BlockSpec((tg, O), lambda i: (i, 0)),
        compiler_params=pltpu.CompilerParams(
            dimension_semantics=("parallel",),             # megacore on v7x
        ),
    )(x2, w1, b1, w2_in, b2)

    return y[:G] if g_pad != G else y


def reference_forward(x, w1, b1, w2, b2):
    pooled = jnp.sum(x, axis=1)
    h = jnp.tanh(pooled @ w1 + b1)
    return h @ w2 + b2


if __name__ == "__main__":
    in_features = 32
    out_features = 1
    G, N = 4, 8  # 4 graphs, 8 'n1' nodes each

    key = jax.random.PRNGKey(0)
    kx, kw1, kb1, kw2, kb2 = jax.random.split(key, 5)

    # node features h for ntype 'n1', dense-batched per graph
    x = jax.random.normal(kx, (G, N, in_features), dtype=jnp.float32)

    # torch.nn.Linear(in, in): weight [in, in], bias [in]
    # torch.nn.Linear(in, out): weight [out, in], bias [out]
    # initialized deterministically; pre-transposed so kernel computes x @ W
    w1_t = jax.random.normal(kw1, (in_features, in_features), jnp.float32) * 0.1
    b1_t = jax.random.normal(kb1, (in_features,), jnp.float32) * 0.1
    w2_t = jax.random.normal(kw2, (out_features, in_features), jnp.float32) * 0.1
    b2_t = jax.random.normal(kb2, (out_features,), jnp.float32) * 0.1

    w1 = w1_t.T                         # (D, D)
    b1 = b1_t.reshape(1, in_features)   # (1, D)
    w2 = w2_t.T                         # (D, O)
    b2 = b2_t.reshape(1, out_features)  # (1, O)

    y = pool_forward(x, w1, b1, w2, b2)
    jax.block_until_ready(y)

    y_ref = reference_forward(x, w1, b1, w2, b2)
    assert y.shape == (G, out_features)
    assert jnp.allclose(y, y_ref, atol=1e-5, rtol=1e-5), (y, y_ref)

    print("KERNEL_OK")
</pallas_src>

<mosaic_0001>
module attributes {stable_mosaic.version = 11 : i64} {
  func.func @_pool_kernel(%arg0: i32, %arg1: memref<4x256xf32, #tpu.memory_space<vmem>>, %arg2: memref<32x32xf32, #tpu.memory_space<vmem>>, %arg3: memref<1x32xf32, #tpu.memory_space<vmem>>, %arg4: memref<1x32xf32, #tpu.memory_space<vmem>>, %arg5: memref<1x1xf32, #tpu.memory_space<vmem>>, %arg6: memref<4x1xf32, #tpu.memory_space<vmem>>) attributes {dimension_semantics = [#tpu.dimension_semantics<parallel>], iteration_bounds = array<i64: 1>, scalar_prefetch = 0 : i64, scratch_operands = 0 : i64, tpu.core_type = #tpu.core_type<tc>, window_params = [{transform_indices = @transform_0, window_bounds = array<i64: 4, 256>}, {pipeline_mode = #tpu.pipeline_mode<synchronous>, transform_indices = @transform_1, window_bounds = array<i64: 32, 32>}, {pipeline_mode = #tpu.pipeline_mode<synchronous>, transform_indices = @transform_2, window_bounds = array<i64: 1, 32>}, {pipeline_mode = #tpu.pipeline_mode<synchronous>, transform_indices = @transform_3, window_bounds = array<i64: 1, 32>}, {pipeline_mode = #tpu.pipeline_mode<synchronous>, transform_indices = @transform_4, window_bounds = array<i64: 1, 1>}, {transform_indices = @transform_5, window_bounds = array<i64: 4, 1>}]} {
    %c0 = arith.constant 0 : index
    %c0_0 = arith.constant 0 : index
    %0 = vector.load %arg1[%c0, %c0_0] : memref<4x256xf32, #tpu.memory_space<vmem>>, vector<4x256xf32>
    %1 = vector.extract_strided_slice %0 {offsets = [0, 0], sizes = [4, 32], strides = [1, 1]} : vector<4x256xf32> to vector<4x32xf32>
    %2 = vector.extract_strided_slice %0 {offsets = [0, 32], sizes = [4, 32], strides = [1, 1]} : vector<4x256xf32> to vector<4x32xf32>
    %3 = arith.addf %1, %2 : vector<4x32xf32>
    %4 = vector.extract_strided_slice %0 {offsets = [0, 64], sizes = [4, 32], strides = [1, 1]} : vector<4x256xf32> to vector<4x32xf32>
    %5 = arith.addf %3, %4 : vector<4x32xf32>
    %6 = vector.extract_strided_slice %0 {offsets = [0, 96], sizes = [4, 32], strides = [1, 1]} : vector<4x256xf32> to vector<4x32xf32>
    %7 = arith.addf %5, %6 : vector<4x32xf32>
    %8 = vector.extract_strided_slice %0 {offsets = [0, 128], sizes = [4, 32], strides = [1, 1]} : vector<4x256xf32> to vector<4x32xf32>
    %9 = arith.addf %7, %8 : vector<4x32xf32>
    %10 = vector.extract_strided_slice %0 {offsets = [0, 160], sizes = [4, 32], strides = [1, 1]} : vector<4x256xf32> to vector<4x32xf32>
    %11 = arith.addf %9, %10 : vector<4x32xf32>
    %12 = vector.extract_strided_slice %0 {offsets = [0, 192], sizes = [4, 32], strides = [1, 1]} : vector<4x256xf32> to vector<4x32xf32>
    %13 = arith.addf %11, %12 : vector<4x32xf32>
    %14 = vector.extract_strided_slice %0 {offsets = [0, 224], sizes = [4, 32], strides = [1, 1]} : vector<4x256xf32> to vector<4x32xf32>
    %15 = arith.addf %13, %14 : vector<4x32xf32>
    %c0_1 = arith.constant 0 : index
    %c0_2 = arith.constant 0 : index
    %16 = vector.load %arg2[%c0_1, %c0_2] : memref<32x32xf32, #tpu.memory_space<vmem>>, vector<32x32xf32>
    %cst = arith.constant dense<0.000000e+00> : vector<4x32xf32>
    %17 = tpu.matmul %15, %16, %cst {dimension_numbers = #tpu.dot_dimension_numbers<[1], [0], [0], [1], [0, 0, 1, 1], [], []>} : vector<4x32xf32>, vector<32x32xf32>, vector<4x32xf32> -> vector<4x32xf32>
    %c0_3 = arith.constant 0 : index
    %c0_4 = arith.constant 0 : index
    %18 = vector.load %arg3[%c0_3, %c0_4] : memref<1x32xf32, #tpu.memory_space<vmem>>, vector<1x32xf32>
    %19 = vector.broadcast %18 : vector<1x32xf32> to vector<4x32xf32>
    %20 = arith.addf %17, %19 : vector<4x32xf32>
    %21 = math.tanh %20 : vector<4x32xf32>
    %c0_5 = arith.constant 0 : index
    %c0_6 = arith.constant 0 : index
    %22 = vector.load %arg4[%c0_5, %c0_6] : memref<1x32xf32, #tpu.memory_space<vmem>>, vector<1x32xf32>
    %23 = vector.broadcast %22 : vector<1x32xf32> to vector<4x32xf32>
    %24 = arith.mulf %21, %23 : vector<4x32xf32>
    %cst_7 = arith.constant dense<0.000000e+00> : vector<4xf32>
    %25 = vector.multi_reduction <add>, %24, %cst_7 [1] : vector<4x32xf32> to vector<4xf32>
    %26 = vector.shape_cast %25 : vector<4xf32> to vector<4x1xf32>
    %c0_8 = arith.constant 0 : index
    %c0_9 = arith.constant 0 : index
    %27 = vector.load %arg5[%c0_8, %c0_9] : memref<1x1xf32, #tpu.memory_space<vmem>>, vector<1x1xf32>
    %28 = vector.broadcast %27 : vector<1x1xf32> to vector<4x1xf32>
    %29 = arith.addf %26, %28 : vector<4x1xf32>
    %c0_10 = arith.constant 0 : index
    %c0_11 = arith.constant 0 : index
    %30 = vector.load %arg6[%c0_10, %c0_11] : memref<4x1xf32, #tpu.memory_space<vmem>>, vector<4x1xf32>
    tpu.vector_store %arg6[%c0_10, %c0_11], %29 {strides = array<i32>} : memref<4x1xf32, #tpu.memory_space<vmem>>, vector<4x1xf32>,
    return
  }
  func.func @transform_0(%arg0: i32) -> (i32, i32) {
    %c0_i32 = arith.constant 0 : i32
    %c0_i32_0 = arith.constant 0 : i32
    return %arg0, %c0_i32 : i32, i32
  }
  func.func @transform_1(%arg0: i32) -> (i32, i32) {
    %c0_i32 = arith.constant 0 : i32
    %c0_i32_0 = arith.constant 0 : i32
    %c0_i32_1 = arith.constant 0 : i32
    return %c0_i32, %c0_i32_0 : i32, i32
  }
  func.func @transform_2(%arg0: i32) -> (i32, i32) {
    %c0_i32 = arith.constant 0 : i32
    %c0_i32_0 = arith.constant 0 : i32
    %c0_i32_1 = arith.constant 0 : i32
    return %c0_i32, %c0_i32_0 : i32, i32
  }
  func.func @transform_3(%arg0: i32) -> (i32, i32) {
    %c0_i32 = arith.constant 0 : i32
    %c0_i32_0 = arith.constant 0 : i32
    %c0_i32_1 = arith.constant 0 : i32
    return %c0_i32, %c0_i32_0 : i32, i32
  }
  func.func @transform_4(%arg0: i32) -> (i32, i32) {
    %c0_i32 = arith.constant 0 : i32
    %c0_i32_0 = arith.constant 0 : i32
    %c0_i32_1 = arith.constant 0 : i32
    return %c0_i32, %c0_i32_0 : i32, i32
  }
  func.func @transform_5(%arg0: i32) -> (i32, i32) {
    %c0_i32 = arith.constant 0 : i32
    %c0_i32_0 = arith.constant 0 : i32
    return %arg0, %c0_i32 : i32, i32
  }
}

</mosaic_0001>

<bundles_post_ra>
// kernel: tpu_custom_call.1
= control target key start
LH: loop header
LB: loop body
LE: loop exit
PB: predicated region body
PF: predicated region fallthrough
CT: control target
= control target key end

     0   :  { %s253_s0 = inlined_call_operand.hbm [shape: f32[4,256], index: 0, kind: input, shape index: {}]   ;;  %s254_s1 = inlined_call_operand.hbm [shape: f32[32,32], index: 1, kind: input, shape index: {}]   ;;  %s255_s2 = inlined_call_operand.vmem [shape: f32[1,32], index: 2, kind: input, shape index: {}]   ;;  %s256_s3 = inlined_call_operand.vmem [shape: f32[1,32], index: 3, kind: input, shape index: {}]   ;;  %s257_s4 = inlined_call_operand.<no memory space> [shape: f32[1,1], index: 4, kind: input, shape index: {}]   ;;  %s258_s5 = inlined_call_operand.vmem [shape: f32[4,1], index: 5, kind: output, shape index: {}]  }
   0x1   :  { %v10_v0 = vstv %s257_s4 }
   0x2   :  { %11 = vst [vmem:[#allocation2] sm:$0x1] %v10_v0 }
   0x3   :  { %12 = vsyncpa [#allocation4], 0  ;;  %s19_s22 = sshll.u32 %s253_s0, 4  ;;  %s20_s22 = int_to_ptr.hbm [resolvable:$true] %s19_s22 }
   0x4   :  { %13 = vsyncpa [#allocation6], 0  ;;  %s198_s23 = smov [#allocation3]   ;;  %s29_s27 = sshll.u32 %s254_s1, 4  ;;  %s30_s27 = int_to_ptr.hbm [resolvable:$true] %s29_s27 }
   0x5   :  { %s21_s24 = sshll.u32 %s198_s23, 4  ;;  %s199_s28 = smov [#allocation5]   ;;  %s22_s24 = int_to_ptr.vmem [resolvable:$true] %s21_s24 }
   0x6   :  { %24 = dma.hbm_to_vmem [thread:$0]  %s20_s22, 128, %s22_s24, [#allocation4]  }
   0x7   :  { %s31_s29 = sshll.u32 %s199_s28, 4  ;;  %s200_s4 = smov 128   ;;  %s32_s29 = int_to_ptr.vmem [resolvable:$true] %s31_s29 }
   0x8   :  { %s201_s30 = smov 8  }
   0x9   :  { %37 = dma.hbm_to_vmem [thread:$0]  %s30_s27, 512, %s32_s29, [#allocation6], %s200_s4, %s200_s4, %s201_s30  }
   0xa   :  { %194 = dma.done.wait [#allocation4], 128  }
   0xb   :  { %195 = vsyncadd [#allocation4], 4294967168 }
   0xc   :  { %196 = dma.done.wait [#allocation6], 512  }
   0xd   :  { %197 = vsyncadd [#allocation6], 4294966784  ;;  %v52_v1 = vld [vmem:[#allocation3] sm:$0xff]  ;;  %s202_s0 = smov 96   ;;  %s203_s6 = smov 32   ;;  %v80_v3 = vld [vmem:[#allocation5 + $0x10] sm:$0xff] }
   0xe   :  { %54 = vrot.lane.b32.xlu0 %v52_v1, %s202_s0  ;;  %62 = vrot.lane.b32.xlu1 %v52_v1, %s203_s6  ;;  %s204_s7 = smov 64   ;;  %v81_v2 = vld [vmem:[#allocation5 + $0x18] sm:$0xff]  ;;  %v79_v4 = vld [vmem:[#allocation5 + $0x8] sm:$0xff]  ;;  %v78_v5 = vld [vmem:[#allocation5] sm:$0xff]  ;;  %v66_v11 = vrot.slane %v52_v1, 4  ;;  %vm86_vm0 = vcmask 261120  }
   0xf   :  { %102 = vmatpush.msra.mxu0 %v81_v2  ;;  %v141_v20 = vld [vmem:[%s255_s2] ss:$0 sm:$0xff]  ;;  %vm116_vm1 = vcmask 257024   ;;  %vm125_vm2 = vcmask 3072  }
  0x10   :  { %v142_v23 = vld [vmem:[%s256_s3] ss:$0 sm:$0xff] }
  0x11   :  { %103 = vmatpush.msra.mxu0 %v80_v3  ;;  %v143_v27 = vld [vmem:[#allocation2] ss:$0 sm:$0xff] }
  0x13   :  { %104 = vmatpush.msra.mxu0 %v79_v4 }
  0x15   :  { %105 = vmatpush.msra.mxu0 %v78_v5 }
  0x16   :  { %58 = vrot.lane.b32.xlu0 %v52_v1, %s204_s7 }
  0x80   :  { %v55_v6 = vpop.permute.xlu0 %54  ;;  %v63_v9 = vpop.permute.xlu1 %62 }
  0x81   :  { %v57_v7 = vadd.f32 %v55_v6, %v52_v1  ;;  %v69_v13 = vrot.slane %v55_v6, 4  ;;  %v75_v18 = vrot.slane %v63_v9, 4 }
  0x88   :  { %v59_v8 = vpop.permute.xlu0 %58 }
  0x89   :  { %v61_v10 = vadd.f32 %v59_v8, %v57_v7  ;;  %v72_v15 = vrot.slane %v59_v8, 4 }
  0x8b   :  { %v65_v12 = vadd.f32 %v63_v9, %v61_v10 }
  0x8d   :  { %v68_v14 = vadd.f32 %v66_v11, %v65_v12 }
  0x8f   :  { %v71_v16 = vadd.f32 %v69_v13, %v68_v14 }
  0x91   :  { %v74_v17 = vadd.f32 %v72_v15, %v71_v16 }
  0x93   :  { %v77_v19 = vadd.f32 %v75_v18, %v74_v17 }
  0x95   :  { %133 = vmatmul.msk.f32.vlgmr.msra.gmra.mxu0 %vm86_vm0, %v77_v19 }
 0x112   :  { %v107_v21 = vpop.f32.mrf.mxu0 }
 0x113   :  { %v108_v22 = vadd.f32 %v141_v20, %v107_v21 }
 0x115   :  { %144 = vtanh.f32 %v108_v22 }
 0x11b   :  { %v145_v24 = vpop.eup %144 }
 0x11c   :  { %v115_v25 = vmul.f32 %v145_v24, %v142_v23 }
 0x11e   :  { %v117_v26 = vsel %vm116_vm1, %v115_v25, 0.0 }
 0x11f   :  { %118 = vadd.xlane.f32.xlu1 %v117_v26 }
 0x192   :  { %v119_v28 = vpop.xlane.xlu1 %118 }
 0x193   :  { %v124_v29 = vadd.f32 %v143_v27, %v119_v28 }
 0x195   :  { %126 = vst.msk [vmem:[%s258_s5] sm:$0xf] %vm125_vm2, %v124_v29 }
 0x196   :  { %131 = vsyncpa [#allocation4], 1 }
 0x197   :  { %132 = vsyncpa [#allocation6], 1 }

</bundles_post_ra>
